<compile_context>
chip_gen: v7x
topology: tpu7x:2x2x1
jax: 0.10.0
libtpu: 0.0.40
codegen_flags: <defaults>
</compile_context>

<pallas_src>
import jax
import jax.numpy as jnp
from jax import lax
from jax.experimental import pallas as pl
from jax.experimental.pallas import tpu as pltpu


def dnn3_kernel(x_ref, w1t_ref, b1_ref, w2_ref, b2_ref, w3_ref, b3_ref, o_ref):
    # x tile: (TILE_B, F); bf16 MXU operands, f32 accumulation.  The cast is a
    # no-op if the caller already supplies bf16 activations.
    x = x_ref[...].astype(jnp.bfloat16)

    # fc1 in natural MXU orientation (contraction on x's lane dim): the big
    # streamed tile is never transposed.  (TILE_B, F) @ (F, 16) -> (TILE_B, 16)
    h1 = jnp.dot(x, w1t_ref[...], preferred_element_type=jnp.float32)
    h1 = jnp.maximum(h1 + b1_ref[...], 0.0)               # + (1, 16) bias, ReLU

    # fc2 flips batch onto the lane axis: NT dot_general whose transposed
    # operand is only the small bf16 (TILE_B, 16) intermediate, not x.
    # (8, 16) . (TILE_B, 16)^T -> (8, TILE_B)
    h2 = lax.dot_general(w2_ref[...], h1.astype(jnp.bfloat16),
                         (((1,), (1,)), ((), ())),
                         preferred_element_type=jnp.float32)
    h2 = jnp.maximum(h2 + b2_ref[...], 0.0)               # + (8, 1) bias, ReLU

    # fc3 (8 -> 1) on VPU + sublane reduce; output stays lane-dense so the
    # (1, TILE_B) block is written with unmasked stores.
    out = jnp.sum(h2 * w3_ref[...], axis=0, keepdims=True) + b3_ref[...]
    o_ref[...] = out.astype(o_ref.dtype)


def _round_up(n, m):
    return ((n + m - 1) // m) * m


def _resident_spec(arr):
    """Full-array block at a constant block index -> stays resident in VMEM."""
    zeros = (0,) * arr.ndim
    return pl.BlockSpec(arr.shape, lambda i: zeros)


def _prep_params(params):
    """Torch-layout params -> kernel operand layout (bf16 weights, f32 biases)."""
    w1, b1, w2, b2, w3, b3 = params
    return (w1.T.astype(jnp.bfloat16),                 # (F, 16)  fc1 RHS
            b1.reshape(1, -1).astype(jnp.float32),     # (1, 16)
            w2.astype(jnp.bfloat16),                   # (8, 16)  fc2 LHS (NT dot)
            b2.reshape(-1, 1).astype(jnp.float32),     # (8, 1)
            w3.reshape(-1, 1).astype(jnp.float32),     # (8, 1)   fc3 column
            b3.reshape(1, 1).astype(jnp.float32))      # (1, 1)


def _choose_tile_b(B, F, requested):
    """Batch tile: multiple of 128, sized against the lane-padded x stream."""
    f_lanes = _round_up(F, 128)                 # (TILE_B, F) block lane-pads F
    # Keep the double-buffered x stream within ~32 MiB (sized as f32).
    max_rows = (32 * 1024 * 1024) // (2 * f_lanes * 4)
    tile_b = min(requested, max_rows, _round_up(B, 128))
    tile_b = max(128, (tile_b // 128) * 128)
    # Guarantee >= 2 grid steps when the batch allows it, so the "parallel"
    # batch axis actually feeds both v7x TensorCores.
    if B > 128 and pl.cdiv(B, tile_b) < 2:
        tile_b = max(128, _round_up(pl.cdiv(B, 2), 128))
    return tile_b


def dnn3_forward(x, params, tile_b=16384):
    """x: (B, F) float32/bfloat16 -> (B, 1) float32, eval-mode DNN3 forward."""
    B, F = x.shape
    w1t, b1, w2, b2, w3, b3 = _prep_params(params)

    tile_b = _choose_tile_b(B, F, tile_b)
    grid = (pl.cdiv(B, tile_b),)        # no padded copy of x; the edge block's
                                        # output store is masked by Pallas.
    f_lanes = _round_up(F, 128)
    vmem_limit = min(48 * 1024 * 1024,
                     2 * tile_b * f_lanes * 4 + 16 * 1024 * 1024)

    out = pl.pallas_call(
        dnn3_kernel,
        out_shape=jax.ShapeDtypeStruct((1, B), jnp.float32),
        grid=grid,
        in_specs=[
            # x streamed over batch.  (Optionally pipeline_mode=pl.Buffered(3)
            # here if a v7x bundle dump shows exposed DMA waits.)
            pl.BlockSpec((tile_b, F), lambda i: (i, 0)),
            _resident_spec(w1t), _resident_spec(b1),
            _resident_spec(w2), _resident_spec(b2),
            _resident_spec(w3), _resident_spec(b3),
        ],
        out_specs=pl.BlockSpec((1, tile_b), lambda i: (0, i)),  # lane-dense out
        compiler_params=pltpu.CompilerParams(
            dimension_semantics=("parallel",),
            vmem_limit_bytes=vmem_limit),
        cost_estimate=pl.CostEstimate(
            flops=2 * B * (F * 16 + 16 * 8 + 8),
            transcendentals=0,
            bytes_accessed=B * (F * x.dtype.itemsize + 4)),
    )(x, w1t, b1, w2, b2, w3, b3)

    # (1, B) row -> (B, 1) column; pure relabeling reshape (cheap in XLA).
    return out.reshape(B, 1)


def init_params(key, in_feat_num):
    """Deterministic init mirroring nn.Linear: U(-1/sqrt(fan_in), 1/sqrt(fan_in)).

    Weights are stored torch-style as (out, in); biases as (out,).
    """
    def linear(k, fan_in, fan_out):
        kw, kb = jax.random.split(k)
        bound = 1.0 / jnp.sqrt(fan_in)
        w = jax.random.uniform(kw, (fan_out, fan_in), jnp.float32, -bound, bound)
        b = jax.random.uniform(kb, (fan_out,), jnp.float32, -bound, bound)
        return w, b

    k1, k2, k3 = jax.random.split(key, 3)
    w1, b1 = linear(k1, in_feat_num, 16)
    w2, b2 = linear(k2, 16, 8)
    w3, b3 = linear(k3, 8, 1)
    return (w1, b1, w2, b2, w3, b3)


def dnn3_reference(x, params):
    """Pure-JAX reference mirroring the kernel's bf16-operand / f32-accumulate math."""
    w1, b1, w2, b2, w3, b3 = params
    xb = x.astype(jnp.bfloat16)
    h1 = jnp.maximum(
        jnp.dot(xb, w1.astype(jnp.bfloat16).T,
                preferred_element_type=jnp.float32) + b1, 0.0)
    h2 = jnp.maximum(
        jnp.dot(h1.astype(jnp.bfloat16), w2.astype(jnp.bfloat16).T,
                preferred_element_type=jnp.float32) + b2, 0.0)
    return jnp.dot(h2, w3.T, precision=lax.Precision.HIGHEST) + b3


if __name__ == "__main__":
    key = jax.random.PRNGKey(0)
    kx, kp, kx2, kx3 = jax.random.split(key, 4)

    B, IN_FEAT = 2, 32
    x = jax.random.normal(kx, (B, IN_FEAT), jnp.float32)
    params = init_params(kp, IN_FEAT)

    out = jax.block_until_ready(dnn3_forward(x, params))
    ref = dnn3_reference(x, params)
    assert out.shape == (B, 1), out.shape
    assert jnp.allclose(out, ref, atol=2e-3, rtol=2e-3), "mismatch vs reference"

    # Multi-tile, non-divisible batch (grid=3, masked edge-block output store).
    B2 = 300
    x2 = jax.random.normal(kx2, (B2, IN_FEAT), jnp.float32)
    out2 = jax.block_until_ready(dnn3_forward(x2, params, tile_b=128))
    ref2 = dnn3_reference(x2, params)
    assert out2.shape == (B2, 1), out2.shape
    assert jnp.allclose(out2, ref2, atol=2e-3, rtol=2e-3), "mismatch (multi-tile)"

    # Adaptive tile split: B < default tile -> tile shrinks so grid == 2.
    B3 = 1000
    x3 = jax.random.normal(kx3, (B3, IN_FEAT), jnp.float32)
    out3 = jax.block_until_ready(dnn3_forward(x3, params))
    ref3 = dnn3_reference(x3, params)
    assert out3.shape == (B3, 1), out3.shape
    assert jnp.allclose(out3, ref3, atol=2e-3, rtol=2e-3), "mismatch (adaptive tile)"

    print("KERNEL_OK")
</pallas_src>

<mosaic_0001>
module attributes {stable_mosaic.version = 11 : i64} {
  func.func @dnn3_kernel(%arg0: i32, %arg1: memref<128x32xf32, #tpu.memory_space<vmem>>, %arg2: memref<32x16xbf16, #tpu.memory_space<vmem>>, %arg3: memref<1x16xf32, #tpu.memory_space<vmem>>, %arg4: memref<8x16xbf16, #tpu.memory_space<vmem>>, %arg5: memref<8x1xf32, #tpu.memory_space<vmem>>, %arg6: memref<8x1xf32, #tpu.memory_space<vmem>>, %arg7: memref<1x1xf32, #tpu.memory_space<vmem>>, %arg8: memref<1x128xf32, #tpu.memory_space<vmem>>) attributes {dimension_semantics = [#tpu.dimension_semantics<parallel>], iteration_bounds = array<i64: 1>, scalar_prefetch = 0 : i64, scratch_operands = 0 : i64, tpu.core_type = #tpu.core_type<tc>, window_params = [{transform_indices = @transform_0, window_bounds = array<i64: 128, 32>}, {pipeline_mode = #tpu.pipeline_mode<synchronous>, transform_indices = @transform_1, window_bounds = array<i64: 32, 16>}, {pipeline_mode = #tpu.pipeline_mode<synchronous>, transform_indices = @transform_2, window_bounds = array<i64: 1, 16>}, {pipeline_mode = #tpu.pipeline_mode<synchronous>, transform_indices = @transform_3, window_bounds = array<i64: 8, 16>}, {pipeline_mode = #tpu.pipeline_mode<synchronous>, transform_indices = @transform_4, window_bounds = array<i64: 8, 1>}, {pipeline_mode = #tpu.pipeline_mode<synchronous>, transform_indices = @transform_5, window_bounds = array<i64: 8, 1>}, {pipeline_mode = #tpu.pipeline_mode<synchronous>, transform_indices = @transform_6, window_bounds = array<i64: 1, 1>}, {transform_indices = @transform_7, window_bounds = array<i64: 1, 128>}]} {
    %c0 = arith.constant 0 : index
    %c0_0 = arith.constant 0 : index
    %0 = vector.load %arg1[%c0, %c0_0] : memref<128x32xf32, #tpu.memory_space<vmem>>, vector<128x32xf32>
    %1 = arith.truncf %0 : vector<128x32xf32> to vector<128x32xbf16>
    %c0_1 = arith.constant 0 : index
    %c0_2 = arith.constant 0 : index
    %2 = vector.load %arg2[%c0_1, %c0_2] : memref<32x16xbf16, #tpu.memory_space<vmem>>, vector<32x16xbf16>
    %cst = arith.constant dense<0.000000e+00> : vector<128x16xf32>
    %3 = tpu.matmul %1, %2, %cst {dimension_numbers = #tpu.dot_dimension_numbers<[1], [0], [0], [1], [0, 0, 1, 1], [], []>} : vector<128x32xbf16>, vector<32x16xbf16>, vector<128x16xf32> -> vector<128x16xf32>
    %c0_3 = arith.constant 0 : index
    %c0_4 = arith.constant 0 : index
    %4 = vector.load %arg3[%c0_3, %c0_4] : memref<1x16xf32, #tpu.memory_space<vmem>>, vector<1x16xf32>
    %5 = vector.broadcast %4 : vector<1x16xf32> to vector<128x16xf32>
    %6 = arith.addf %3, %5 : vector<128x16xf32>
    %cst_5 = arith.constant 0.000000e+00 : f32
    %7 = vector.broadcast %cst_5 : f32 to vector<128x16xf32>
    %8 = arith.maximumf %6, %7 : vector<128x16xf32>
    %c0_6 = arith.constant 0 : index
    %c0_7 = arith.constant 0 : index
    %9 = vector.load %arg4[%c0_6, %c0_7] : memref<8x16xbf16, #tpu.memory_space<vmem>>, vector<8x16xbf16>
    %10 = arith.truncf %8 : vector<128x16xf32> to vector<128x16xbf16>
    %cst_8 = arith.constant dense<0.000000e+00> : vector<8x128xf32>
    %11 = tpu.matmul %9, %10, %cst_8 {dimension_numbers = #tpu.dot_dimension_numbers<[1], [1], [0], [0], [0, 0, 1, 0], [], []>} : vector<8x16xbf16>, vector<128x16xbf16>, vector<8x128xf32> -> vector<8x128xf32>
    %c0_9 = arith.constant 0 : index
    %c0_10 = arith.constant 0 : index
    %12 = vector.load %arg5[%c0_9, %c0_10] : memref<8x1xf32, #tpu.memory_space<vmem>>, vector<8x1xf32>
    %13 = vector.broadcast %12 : vector<8x1xf32> to vector<8x128xf32>
    %14 = arith.addf %11, %13 : vector<8x128xf32>
    %cst_11 = arith.constant 0.000000e+00 : f32
    %15 = vector.broadcast %cst_11 : f32 to vector<8x128xf32>
    %16 = arith.maximumf %14, %15 : vector<8x128xf32>
    %c0_12 = arith.constant 0 : index
    %c0_13 = arith.constant 0 : index
    %17 = vector.load %arg6[%c0_12, %c0_13] : memref<8x1xf32, #tpu.memory_space<vmem>>, vector<8x1xf32>
    %18 = vector.broadcast %17 : vector<8x1xf32> to vector<8x128xf32>
    %19 = arith.mulf %16, %18 : vector<8x128xf32>
    %cst_14 = arith.constant dense<0.000000e+00> : vector<128xf32>
    %20 = vector.multi_reduction <add>, %19, %cst_14 [0] : vector<8x128xf32> to vector<128xf32>
    %21 = vector.shape_cast %20 : vector<128xf32> to vector<1x128xf32>
    %c0_15 = arith.constant 0 : index
    %c0_16 = arith.constant 0 : index
    %22 = vector.load %arg7[%c0_15, %c0_16] : memref<1x1xf32, #tpu.memory_space<vmem>>, vector<1x1xf32>
    %23 = vector.broadcast %22 : vector<1x1xf32> to vector<1x128xf32>
    %24 = arith.addf %21, %23 : vector<1x128xf32>
    %c0_17 = arith.constant 0 : index
    %c0_18 = arith.constant 0 : index
    %25 = vector.load %arg8[%c0_17, %c0_18] : memref<1x128xf32, #tpu.memory_space<vmem>>, vector<1x128xf32>
    tpu.vector_store %arg8[%c0_17, %c0_18], %24 {strides = array<i32>} : memref<1x128xf32, #tpu.memory_space<vmem>>, vector<1x128xf32>,
    return
  }
  func.func @transform_0(%arg0: i32) -> (i32, i32) {
    %c0_i32 = arith.constant 0 : i32
    %c0_i32_0 = arith.constant 0 : i32
    return %arg0, %c0_i32 : i32, i32
  }
  func.func @transform_1(%arg0: i32) -> (i32, i32) {
    %c0_i32 = arith.constant 0 : i32
    %c0_i32_0 = arith.constant 0 : i32
    %c0_i32_1 = arith.constant 0 : i32
    return %c0_i32, %c0_i32_0 : i32, i32
  }
  func.func @transform_2(%arg0: i32) -> (i32, i32) {
    %c0_i32 = arith.constant 0 : i32
    %c0_i32_0 = arith.constant 0 : i32
    %c0_i32_1 = arith.constant 0 : i32
    return %c0_i32, %c0_i32_0 : i32, i32
  }
  func.func @transform_3(%arg0: i32) -> (i32, i32) {
    %c0_i32 = arith.constant 0 : i32
    %c0_i32_0 = arith.constant 0 : i32
    %c0_i32_1 = arith.constant 0 : i32
    return %c0_i32, %c0_i32_0 : i32, i32
  }
  func.func @transform_4(%arg0: i32) -> (i32, i32) {
    %c0_i32 = arith.constant 0 : i32
    %c0_i32_0 = arith.constant 0 : i32
    %c0_i32_1 = arith.constant 0 : i32
    return %c0_i32, %c0_i32_0 : i32, i32
  }
  func.func @transform_5(%arg0: i32) -> (i32, i32) {
    %c0_i32 = arith.constant 0 : i32
    %c0_i32_0 = arith.constant 0 : i32
    %c0_i32_1 = arith.constant 0 : i32
    return %c0_i32, %c0_i32_0 : i32, i32
  }
  func.func @transform_6(%arg0: i32) -> (i32, i32) {
    %c0_i32 = arith.constant 0 : i32
    %c0_i32_0 = arith.constant 0 : i32
    %c0_i32_1 = arith.constant 0 : i32
    return %c0_i32, %c0_i32_0 : i32, i32
  }
  func.func @transform_7(%arg0: i32) -> (i32, i32) {
    %c0_i32 = arith.constant 0 : i32
    %c0_i32_0 = arith.constant 0 : i32
    return %c0_i32, %arg0 : i32, i32
  }
}

</mosaic_0001>

<bundles_post_ra>
// kernel: tpu_custom_call.1
= control target key start
LH: loop header
LB: loop body
LE: loop exit
PB: predicated region body
PF: predicated region fallthrough
CT: control target
= control target key end

     0   :  { %s592_s0 = inlined_call_operand.vmem [shape: f32[2,32], index: 0, kind: input, shape index: {}]   ;;  %s593_s1 = inlined_call_operand.vmem [shape: bf16[32,16], index: 1, kind: input, shape index: {}]   ;;  %s594_s2 = inlined_call_operand.vmem [shape: f32[1,16], index: 2, kind: input, shape index: {}]   ;;  %s595_s3 = inlined_call_operand.vmem [shape: bf16[8,16], index: 3, kind: input, shape index: {}]   ;;  %s596_s4 = inlined_call_operand.vmem [shape: f32[8,1], index: 4, kind: input, shape index: {}]   ;;  %s597_s5 = inlined_call_operand.vmem [shape: f32[8,1], index: 5, kind: input, shape index: {}]   ;;  %s598_s6 = inlined_call_operand.<no memory space> [shape: f32[1,1], index: 6, kind: input, shape index: {}]   ;;  %s599_s7 = inlined_call_operand.hbm [shape: f32[1,2], index: 7, kind: output, shape index: {}]  }
   0x1   :  { %v12_v0 = vstv %s598_s6 }
   0x2   :  { %13 = vst [vmem:[#allocation2] sm:$0x1] %v12_v0 }
   0x3   :  { %v415_v1 = vld [vmem:[%s593_s1] sm:$0xff]   ;;  %v416_v2 = vld [vmem:[%s593_s1 + $0x8] sm:$0xff]   ;;  %vm77_vm0 = vcmask 261120   ;;  %v32_v6 = vld [vmem:[%s592_s0 + $0x10] sm:$0xff] }
   0x4   :  { %369 = vmatprep.subr.bf16.mxu0 %v415_v1  ;;  %v30_v3 = vld [vmem:[%s592_s0] sm:$0xff]  ;;  %v31_v4 = vld [vmem:[%s592_s0 + $0x8] sm:$0xff]  ;;  %v33_v7 = vld [vmem:[%s592_s0 + $0x18] sm:$0xff] }
   0x5   :  { %370 = vmatpush3.bf16.msra.mxu0 %v415_v1  ;;  %v46_v5 = vpack.c.bf16 %v31_v4, %v30_v3  ;;  %v34_v8 = vld [vmem:[%s592_s0 + $0x20] sm:$0xff]  ;;  %v35_v9 = vld [vmem:[%s592_s0 + $0x28] sm:$0xff]  ;;  %v47_v10 = vpack.c.bf16 %v33_v7, %v32_v6 }
   0x6   :  { %371 = vmatprep.subr.bf16.mxu0 %v416_v2  ;;  %v48_v11 = vpack.c.bf16 %v35_v9, %v34_v8 }
   0x7   :  { %373 = vmatprep.mubr.msk.bf16.mxu0 %vm77_vm0, %v46_v5 }
   0x9   :  { %372 = vmatpush3.bf16.msra.mxu0 %v416_v2 }
   0xa   :  { %14 = vsyncpa [#allocation4], 0  ;;  %v36_v12 = vld [vmem:[%s592_s0 + $0x30] sm:$0xff]  ;;  %v37_v13 = vld [vmem:[%s592_s0 + $0x38] sm:$0xff]  ;;  %v441_v27 = vmov 0.0   ;;  %vm442_vm1 = vmmov 0  }
   0xb   :  { %v38_v14 = vld [vmem:[%s592_s0 + $0x40] sm:$0xff]  ;;  %v39_v15 = vld [vmem:[%s592_s0 + $0x48] sm:$0xff]  ;;  %v49_v16 = vpack.c.bf16 %v37_v13, %v36_v12  ;;  %v40_v18 = vld [vmem:[%s592_s0 + $0x50] sm:$0xff]  ;;  %389 = vmatprep.subr.bf16.mxu1 %v441_v27  ;;  %405 = vmatprep.mubr.msk.bf16.mxu1 %vm442_vm1, %v441_v27  ;;  %v443_v30 = vmov 0   ;;  %vm230_vm2 = vcmask 130048  }
   0xc   :  { %374 = vmatmul.mubr.msk.bf16.vlgmr.msra.gmra.mrb[0].mxu0 %vm77_vm0, %v47_v10  ;;  %v50_v17 = vpack.c.bf16 %v39_v15, %v38_v14  ;;  %v41_v19 = vld [vmem:[%s592_s0 + $0x58] sm:$0xff]  ;;  %v42_v20 = vld [vmem:[%s592_s0 + $0x60] sm:$0xff]  ;;  %v43_v21 = vld [vmem:[%s592_s0 + $0x68] sm:$0xff]  ;;  %413 = vset.pattern.permute.xlu0 %v443_v30 }
   0xd   :  { %377 = vmatprep.mubr.msk.bf16.mxu0 %vm77_vm0, %v48_v11  ;;  %v51_v22 = vpack.c.bf16 %v41_v19, %v40_v18  ;;  %v52_v23 = vpack.c.bf16 %v43_v21, %v42_v20  ;;  %v44_v24 = vld [vmem:[%s592_s0 + $0x70] sm:$0xff]  ;;  %v45_v25 = vld [vmem:[%s592_s0 + $0x78] sm:$0xff]  ;;  %v224_v28 = vld [vmem:[%s596_s4] sm:$0xff]  ;;  %414 = vset.pattern.permute.xlu1 %v443_v30 }
   0xe   :  { %v53_v26 = vpack.c.bf16 %v45_v25, %v44_v24  ;;  %v312_v29 = vld [vmem:[#allocation2] sm:$0x1]  ;;  %227 = vperm.xlu0 %413, %v224_v28  }
   0xf   :  { %315 = vperm.xlu1 %414, %v312_v29   ;;  %v299_v31 = vld [vmem:[%s597_s5] sm:$0xff] }
  0x10   :  { %v338_v32 = vld [vmem:[%s594_s2] ss:$0 sm:$0xff] }
  0x12   :  { %302 = vperm.xlu0 %413, %v299_v31  }
  0x14   :  { %378 = vmatmul.mubr.msk.bf16.gmra.mrb[4].mxu0 %vm77_vm0, %v49_v16 }
  0x15   :  { %381 = vmatprep.mubr.msk.bf16.mxu0 %vm77_vm0, %v50_v17 }
  0x1c   :  { %382 = vmatmul.mubr.msk.bf16.gmra.mrb[8].mxu0 %vm77_vm0, %v51_v22 }
  0x1d   :  { %385 = vmatprep.mubr.msk.bf16.mxu0 %vm77_vm0, %v52_v23 }
  0x24   :  { %386 = vmatmul.mubr.msk.bf16.gmra.mrb[12].mxu0 %vm77_vm0, %v53_v26 }
  0xdf   :  { %v375_v33 = vpop.f32.mrb[0].mxu0 }
  0xe0   :  { %v145_v34 = vadd.f32 %v375_v33, %v338_v32  ;;  %v136_v35 = vpop.f32.mrb[1].mxu0 }
  0xe1   :  { %v137_v36 = vadd.f32 %v338_v32, %v136_v35  ;;  %v376_v37 = vpop.f32.mrb[2].mxu0  ;;  %v228_v35 = vpop.permute.xlu0 %227 }
  0xe2   :  { %v148_v38 = vadd.f32 %v376_v37, %v338_v32  ;;  %v139_v39 = vpop.f32.mrb[3].mxu0  ;;  %v201_v41 = vmax.f32 %v145_v34, 0.0  ;;  %v215_v34 = vld [vmem:[%s595_s3] sm:$0xf]  ;;  %s444_s3 = smov [#allocation3]  }
  0xe3   :  { %v140_v40 = vadd.f32 %v338_v32, %v139_v39  ;;  %v199_v43 = vmax.f32 %v137_v36, 0.0  ;;  %s330_s5 = sshll.u32 %s444_s3, 4  ;;  %s331_s5 = int_to_ptr.vmem [resolvable:$true] %s330_s5 }
  0xe4   :  { %v202_v42 = vmax.f32 %v148_v38, 0.0  ;;  %s417_s17 = scalar_lea.vmem %s331_s5, 16  ;;  %s421_s18 = scalar_lea.vmem %s331_s5, 32 }
  0xe5   :  { %v200_v44 = vmax.f32 %v140_v40, 0.0  ;;  %p418_p0 = scmp.ne.s32.totalorder %s331_s5, %s417_s17  ;;  %p422_p1 = scmp.lt.s32.totalorder %s331_s5, %s331_s5 }
  0xe6   :  { %v217_v45 = vpack.c.bf16 %v202_v42, %v201_v41  ;;  %v318_v42 = vlaneseq  ;;  %p423_p2 = scmp.lt.s32.totalorder %s421_s18, %s417_s17 }
  0xe7   :  { %v216_v46 = vpack.c.bf16 %v200_v44, %v199_v43  ;;  %v379_v47 = vpop.f32.mrb[4].mxu0  ;;  %v303_v43 = vpop.permute.xlu0 %302 }
  0xe8   :  { %v161_v48 = vadd.f32 %v379_v47, %v338_v32  ;;  %v152_v49 = vpop.f32.mrb[5].mxu0  ;;  %v238_v1 = vsel %vm230_vm2, %v217_v45, 0  ;;  %v319_v45 = vshrl.u32 %v318_v42, 7  ;;  %p424_p3 = por %p423_p2, %p422_p1 }
  0xe9   :  { %v235_v50 = vsel %vm230_vm2, %v216_v46, 0  ;;  %v153_v51 = vadd.f32 %v338_v32, %v152_v49  ;;  %v380_v52 = vpop.f32.mrb[6].mxu0  ;;  %v316_v49 = vpop.permute.xlu1 %315 }
  0xea   :  { %390 = vmatpush3.bf16.xpose.msra.mxu1 %v235_v50  ;;  %v205_v53 = vmax.f32 %v161_v48, 0.0  ;;  %v164_v54 = vadd.f32 %v380_v52, %v338_v32  ;;  %v155_v55 = vpop.f32.mrb[7].mxu0  ;;  %v320_v48 = vsub.s32 0, %v319_v45  ;;  %p425_p4 = pnand %p424_p3, %p418_p0 }
  0xeb   :  { %v203_v56 = vmax.f32 %v153_v51, 0.0  ;;  %v156_v57 = vadd.f32 %v338_v32, %v155_v55  ;;  %391 = vmatprep.subr.bf16.mxu1 %v441_v27 }
  0xec   :  { %v206_v58 = vmax.f32 %v164_v54, 0.0  ;;  %v321_v51 = vrot.slane %v316_v49, %v320_v48 }
  0xed   :  { %v204_v59 = vmax.f32 %v156_v57, 0.0 }
  0xee   :  { %v219_v60 = vpack.c.bf16 %v206_v58, %v205_v53 }
  0xef   :  { %v218_v61 = vpack.c.bf16 %v204_v59, %v203_v56  ;;  %v383_v62 = vpop.f32.mrb[8].mxu0 }
  0xf0   :  { %v177_v63 = vadd.f32 %v383_v62, %v338_v32  ;;  %v168_v0 = vpop.f32.mrb[9].mxu0  ;;  %v244_v29 = vsel %vm230_vm2, %v219_v60, 0 }
  0xf1   :  { %v169_v2 = vadd.f32 %v338_v32, %v168_v0  ;;  %v384_v3 = vpop.f32.mrb[10].mxu0  ;;  %v241_v16 = vsel %vm230_vm2, %v218_v61, 0 }
  0xf2   :  { %392 = vmatpush3.bf16.xpose.msra.mxu1 %v238_v1  ;;  %v209_v4 = vmax.f32 %v177_v63, 0.0  ;;  %v180_v5 = vadd.f32 %v384_v3, %v338_v32  ;;  %v171_v6 = vpop.f32.mrb[11].mxu0 }
  0xf3   :  { %393 = vmatprep.subr.bf16.mxu1 %v441_v27  ;;  %v207_v7 = vmax.f32 %v169_v2, 0.0  ;;  %v172_v8 = vadd.f32 %v338_v32, %v171_v6 }
  0xf4   :  { %v210_v9 = vmax.f32 %v180_v5, 0.0 }
  0xf5   :  { %v208_v10 = vmax.f32 %v172_v8, 0.0 }
  0xf6   :  { %v221_v11 = vpack.c.bf16 %v210_v9, %v209_v4 }
  0xf7   :  { %v220_v12 = vpack.c.bf16 %v208_v10, %v207_v7  ;;  %v387_v13 = vpop.f32.mrb[12].mxu0 }
  0xf8   :  { %v193_v14 = vadd.f32 %v387_v13, %v338_v32  ;;  %v184_v15 = vpop.f32.mrb[13].mxu0  ;;  %v250_v31 = vsel %vm230_vm2, %v221_v11, 0 }
  0xf9   :  { %v185_v17 = vadd.f32 %v338_v32, %v184_v15  ;;  %v388_v18 = vpop.f32.mrb[14].mxu0  ;;  %v247_v30 = vsel %vm230_vm2, %v220_v12, 0 }
  0xfa   :  { %394 = vmatpush3.bf16.xpose.msra.mxu1 %v241_v16  ;;  %v213_v19 = vmax.f32 %v193_v14, 0.0  ;;  %v196_v20 = vadd.f32 %v388_v18, %v338_v32  ;;  %v187_v21 = vpop.f32.mrb[15].mxu0 }
  0xfb   :  { %395 = vmatprep.subr.bf16.mxu1 %v441_v27  ;;  %v211_v22 = vmax.f32 %v185_v17, 0.0  ;;  %v188_v23 = vadd.f32 %v338_v32, %v187_v21 }
  0xfc   :  { %v214_v24 = vmax.f32 %v196_v20, 0.0 }
  0xfd   :  { %v212_v25 = vmax.f32 %v188_v23, 0.0 }
  0xfe   :  { %v223_v26 = vpack.c.bf16 %v214_v24, %v213_v19 }
  0xff   :  { %v222_v28 = vpack.c.bf16 %v212_v25, %v211_v22 }
 0x100   :  { %v256_v33 = vsel %vm230_vm2, %v223_v26, 0 }
 0x101   :  { %v253_v32 = vsel %vm230_vm2, %v222_v28, 0 }
 0x102   :  { %396 = vmatpush3.bf16.xpose.msra.mxu1 %v244_v29 }
 0x103   :  { %397 = vmatprep.subr.bf16.mxu1 %v441_v27 }
 0x10a   :  { %398 = vmatpush3.bf16.xpose.msra.mxu1 %v247_v30 }
 0x10b   :  { %399 = vmatprep.subr.bf16.mxu1 %v441_v27 }
 0x112   :  { %400 = vmatpush3.bf16.xpose.msra.mxu1 %v250_v31 }
 0x113   :  { %401 = vmatprep.subr.bf16.mxu1 %v441_v27 }
 0x11a   :  { %402 = vmatpush3.bf16.xpose.msra.mxu1 %v253_v32 }
 0x11b   :  { %403 = vmatprep.subr.bf16.mxu1 %v441_v27 }
 0x122   :  { %404 = vmatpush3.bf16.xpose.msra.mxu1 %v256_v33 }
 0x129   :  { %406 = vmatmul.mubr.msk.bf16.vlgmr.msra.gmra.mrb[0].mxu1 %vm230_vm2, %v215_v34 }
 0x1fc   :  { %v292_v36 = vpop.f32.mrb[0].mxu1 }
 0x1fd   :  { %v293_v37 = vadd.f32 %v292_v36, %v228_v35  ;;  %v407_v38 = vpop.f32.mrb[1].mxu1 }
 0x1fe   :  { %v295_v39 = vpop.f32.mrb[2].mxu1 }
 0x1ff   :  { %v298_v40 = vmax.f32 %v293_v37, 0.0  ;;  %v408_v41 = vpop.f32.mrb[3].mxu1 }
 0x201   :  { %v305_v44 = vmul.f32 %v303_v43, %v298_v40 }
 0x203   :  { %v306_v27 = vrot.slane %v305_v44, 4 }
 0x205   :  { %v307_v46 = vadd.f32 %v306_v27, %v305_v44 }
 0x207   :  { %v308_v47 = vrot.slane %v307_v46, 2 }
 0x209   :  { %v309_v50 = vadd.f32 %v308_v47, %v307_v46 }
 0x20b   :  { %v310_v52 = vrot.slane %v309_v50, 1 }
 0x20d   :  { %v311_v53 = vadd.f32 %v310_v52, %v309_v50 }
 0x20f   :  { %v322_v54 = vadd.f32 %v321_v51, %v311_v53 }
 0x211   :  { %323 = vst [vmem:[#allocation3] sm:$0x1] %v322_v54 }
 0x212   :  { %428 = shalt.err (!%p425_p4)
}
 0x213   :  { %s429_s21 = scalar_lea.hbm %s599_s7, 16 }
 0x214   :  { %p430_p5 = scmp.ne.s32.totalorder %s599_s7, %s429_s21  ;;  %p433_p6 = scmp.lt.u32.totalorder %s429_s21, %s599_s7 }
 0x216   :  { %p435_p7 = pnand %p433_p6, %p430_p5 }
 0x218   :  { %438 = shalt.err (!%p435_p7)
}
 0x219   :  { %333 = dma.vmem_to_hbm [thread:$0]  %s331_s5, 16, %s599_s7, [#allocation4]  }
 0x21a   :  { %439 = dma.done.wait [#allocation4], 16  }
 0x21b   :  { %440 = vsyncadd [#allocation4], 4294967280 }
 0x21c   :  { %337 = vsyncpa [#allocation4], 1 }

</bundles_post_ra>
